<compile_context>
chip_gen: v7x
topology: tpu7x:2x2x1
jax: 0.10.0
libtpu: 0.0.40
codegen_flags: <defaults>
</compile_context>

<pallas_src>
import functools
import math

import jax
import jax.numpy as jnp
from jax import lax
from jax.experimental import pallas as pl
from jax.experimental.pallas import tpu as pltpu


# Working-set budget for the double-buffered blocks; leaves headroom under the
# 32 MiB scoped-VMEM limit requested below on every TPU generation.
_VMEM_BLOCK_BUDGET = 20 * 1024 * 1024
_VMEM_LIMIT_BYTES = 32 * 1024 * 1024


def _cdiv(a: int, b: int) -> int:
    return -(-a // b)


def _round_up(x: int, m: int) -> int:
    return _cdiv(x, m) * m


def _working_set_bytes(tm, tk, tn, x_item, out_item, k_tiled):
    # Double-buffered x / weight / output blocks + bf16 cast temp of the x
    # tile (+ f32 accumulator when the contraction is tiled).
    return (2 * (tm * tk * x_item + tk * tn * 2 + tm * tn * out_item)
            + tm * tk * 2
            + (tm * tn * 4 if k_tiled else 0))


def _select_tiles(M, K, N, x_item, out_item, budget=_VMEM_BLOCK_BUDGET):
    """Pick (tm, tk, tn, k_tiled).

    Preference: full-K + full-N (weight resident, no accumulator), shrinking
    tm first, then tiling N, and only tiling the contraction for very large
    d_model.
    """
    mp8 = _round_up(max(M, 1), 8)
    tms = [t for t in (512, 256, 128, 64, 32, 16, 8) if t <= mp8]
    if mp8 < 512 and mp8 not in tms:
        tms = [mp8] + tms
    tns = [N] + [t for t in (2048, 1024, 512, 256, 128) if t < N]

    # Preferred: no K grid axis (block spans the whole contraction dim, so K
    # needs no padding either).
    for tn in tns:
        for tm in tms:
            if _working_set_bytes(tm, K, tn, x_item, out_item, False) <= budget:
                return tm, K, tn, False

    # Fallback (huge d_model): tile K with a 128-aligned divisor of padded K.
    kp = _round_up(K, 128)
    tks = [d for d in (4096, 2048, 1024, 512, 256, 128) if d < kp and kp % d == 0]
    tks = tks or [128]
    for tk in tks:
        for tn in tns:
            for tm in tms:
                if _working_set_bytes(tm, tk, tn, x_item, out_item, True) <= budget:
                    return tm, tk, tn, True
    return tms[-1], tks[-1], tns[-1], True


def _linear_fullk_kernel(x_ref, w_ref, b_ref, o_ref, *, compute_dtype):
    # x_ref: (tm, K) native dtype   w_ref: (K, tn) bf16   b_ref: (1, tn) f32
    x = x_ref[...].astype(compute_dtype)          # in-tile cast, VPU work
    acc = jnp.dot(x, w_ref[...], preferred_element_type=jnp.float32)
    o_ref[...] = (acc + b_ref[...]).astype(o_ref.dtype)


def _linear_ktiled_kernel(x_ref, w_ref, b_ref, o_ref, acc_ref, *, compute_dtype):
    k = pl.program_id(2)

    @pl.when(k == 0)
    def _init():
        acc_ref[...] = jnp.zeros_like(acc_ref)

    x = x_ref[...].astype(compute_dtype)
    acc_ref[...] += jnp.dot(x, w_ref[...], preferred_element_type=jnp.float32)

    @pl.when(k == pl.num_programs(2) - 1)
    def _finalize():
        o_ref[...] = (acc_ref[...] + b_ref[...]).astype(o_ref.dtype)


def prepare_for_mha(x, weight, bias, heads, d_k, *, compute_dtype=jnp.bfloat16):
    """Pallas implementation of PrepareForMultiHeadAttention.forward.

    Args:
      x:      [..., d_model]
      weight: [heads*d_k, d_model]   (PyTorch nn.Linear layout)
      bias:   [heads*d_k] or None
      heads, d_k: ints
    Returns:
      [..., heads, d_k] in x.dtype

    NOTE: operands are fed to the MXU in `compute_dtype` (bf16 by default)
    with f32 accumulation — an explicit choice; pass compute_dtype=jnp.float32
    for bit-closer parity with an f32 PyTorch nn.Linear.
    """
    head_shape = x.shape[:-1]
    d_model = x.shape[-1]
    n_out = heads * d_k
    assert weight.shape == (n_out, d_model), weight.shape
    M = math.prod(head_shape) if head_shape else 1
    out_dtype = x.dtype

    x2 = x.reshape(M, d_model)                     # native dtype, no HBM cast pass
    # One-time transpose to MXU-native [K, N]; the weight is read exactly once
    # per call, so this wrapper-side cast/transpose is a single small pass
    # outside the hot loop (store the weight pre-transposed to remove it).
    wT = weight.T.astype(compute_dtype)
    b2 = (bias if bias is not None
          else jnp.zeros((n_out,), jnp.float32)).astype(jnp.float32).reshape(1, n_out)

    x_item = x2.dtype.itemsize
    out_item = jnp.dtype(out_dtype).itemsize
    tm, tk, tn, k_tiled = _select_tiles(M, d_model, n_out, x_item, out_item)

    if k_tiled:
        # The contraction remainder must be explicit zeros in BOTH operands.
        kp = _round_up(d_model, 128)
        if kp != d_model:
            x2 = jnp.pad(x2, ((0, 0), (0, kp - d_model)))
            wT = jnp.pad(wT, ((0, kp - d_model), (0, 0)))
    else:
        kp = d_model                               # block spans the full K dim

    m_tiles = _cdiv(M, tm)
    n_tiles = _cdiv(n_out, tn)

    # v7x has 2 TensorCores: keep >= 2 parallel blocks when the problem is big
    # enough to matter.
    if (not k_tiled and m_tiles * n_tiles < 2
            and M * n_out * d_model >= (1 << 22)):
        if tn == n_out and n_out % 256 == 0:
            tn, n_tiles = n_out // 2, 2
        elif M > 8:
            tm = _round_up(_cdiv(M, 2), 8)
            m_tiles = _cdiv(M, tm)

    w_bytes = wT.size * wT.dtype.itemsize
    cost = pl.CostEstimate(
        flops=2 * M * kp * n_out,
        transcendentals=0,
        bytes_accessed=(n_tiles * x2.size * x_item          # x streamed per N tile
                        + (m_tiles if k_tiled else 1) * w_bytes
                        + M * n_out * out_item
                        + n_out * 4),
    )

    out_shape = jax.ShapeDtypeStruct((M, n_out), out_dtype)

    if not k_tiled:
        # N outermost -> weight block index constant over the inner M sweep,
        # so each weight block is DMA'd once. No accumulator; output written
        # straight from the MXU result (+bias) in the same step.
        grid = (n_tiles, m_tiles)
        grid_spec = pltpu.PrefetchScalarGridSpec(
            num_scalar_prefetch=0, grid=grid,
            in_specs=[
                pl.BlockSpec((tm, kp), lambda j, i: (i, 0)),
                pl.BlockSpec((kp, tn), lambda j, i: (0, j)),
                pl.BlockSpec((1, tn), lambda j, i: (0, j)),
            ],
            out_specs=pl.BlockSpec((tm, tn), lambda j, i: (i, j)),
            scratch_shapes=[])
        kernel = functools.partial(_linear_fullk_kernel,
                                   compute_dtype=compute_dtype)
        dim_sem = ("parallel", "parallel")
    else:
        grid = (n_tiles, m_tiles, kp // tk)
        grid_spec = pltpu.PrefetchScalarGridSpec(
            num_scalar_prefetch=0, grid=grid,
            in_specs=[
                pl.BlockSpec((tm, tk), lambda j, i, k: (i, k)),
                pl.BlockSpec((tk, tn), lambda j, i, k: (k, j)),
                pl.BlockSpec((1, tn), lambda j, i, k: (0, j)),
            ],
            out_specs=pl.BlockSpec((tm, tn), lambda j, i, k: (i, j)),
            scratch_shapes=[pltpu.VMEM((tm, tn), jnp.float32)])
        kernel = functools.partial(_linear_ktiled_kernel,
                                   compute_dtype=compute_dtype)
        dim_sem = ("parallel", "parallel", "arbitrary")

    y = pl.pallas_call(
        kernel,
        out_shape=out_shape,
        grid_spec=grid_spec,
        compiler_params=pltpu.CompilerParams(
            dimension_semantics=dim_sem,
            vmem_limit_bytes=_VMEM_LIMIT_BYTES),
        cost_estimate=cost,
    )(x2, wT, b2)

    return y.reshape(*head_shape, heads, d_k)


if __name__ == "__main__":
    # Small shapes consistent with the module: [seq, batch, d_model]
    seq, batch, d_model = 8, 2, 32
    heads, d_k = 4, 16
    use_bias = True

    key = jax.random.PRNGKey(0)
    kx, kw, kb = jax.random.split(key, 3)

    x = jax.random.normal(kx, (seq, batch, d_model), dtype=jnp.float32)

    # Deterministic parameter init, matching nn.Linear's default uniform range.
    bound = 1.0 / math.sqrt(d_model)
    weight = jax.random.uniform(kw, (heads * d_k, d_model),
                                minval=-bound, maxval=bound, dtype=jnp.float32)
    bias = (jax.random.uniform(kb, (heads * d_k,), minval=-bound, maxval=bound,
                               dtype=jnp.float32) if use_bias else None)

    out = prepare_for_mha(x, weight, bias, heads, d_k)
    out = jax.block_until_ready(out)
    assert out.shape == (seq, batch, heads, d_k), out.shape

    # Reference with the same bf16 operand quantization, f32 accumulate.
    xb = x.astype(jnp.bfloat16).astype(jnp.float32).reshape(-1, d_model)
    wb = weight.astype(jnp.bfloat16).astype(jnp.float32)
    ref = jnp.dot(xb, wb.T, precision=lax.Precision.HIGHEST)
    if bias is not None:
        ref = ref + bias
    ref = ref.reshape(seq, batch, heads, d_k)
    max_err = float(jnp.max(jnp.abs(out.astype(jnp.float32) - ref)))
    assert jnp.allclose(out.astype(jnp.float32), ref, atol=1e-4, rtol=1e-4), max_err

    print("KERNEL_OK")
</pallas_src>

<mosaic_0001>
module attributes {stable_mosaic.version = 11 : i64} {
  func.func @_linear_fullk_kernel(%arg0: i32, %arg1: i32, %arg2: memref<16x32xf32, #tpu.memory_space<vmem>>, %arg3: memref<32x64xbf16, #tpu.memory_space<vmem>>, %arg4: memref<1x64xf32, #tpu.memory_space<vmem>>, %arg5: memref<16x64xf32, #tpu.memory_space<vmem>>) attributes {dimension_semantics = [#tpu.dimension_semantics<parallel>, #tpu.dimension_semantics<parallel>], iteration_bounds = array<i64: 1, 1>, scalar_prefetch = 0 : i64, scratch_operands = 0 : i64, tpu.core_type = #tpu.core_type<tc>, window_params = [{transform_indices = @transform_0, window_bounds = array<i64: 16, 32>}, {transform_indices = @transform_1, window_bounds = array<i64: 32, 64>}, {transform_indices = @transform_2, window_bounds = array<i64: 1, 64>}, {transform_indices = @transform_3, window_bounds = array<i64: 16, 64>}]} {
    %c0 = arith.constant 0 : index
    %c0_0 = arith.constant 0 : index
    %0 = vector.load %arg2[%c0, %c0_0] : memref<16x32xf32, #tpu.memory_space<vmem>>, vector<16x32xf32>
    %1 = arith.truncf %0 : vector<16x32xf32> to vector<16x32xbf16>
    %c0_1 = arith.constant 0 : index
    %c0_2 = arith.constant 0 : index
    %2 = vector.load %arg3[%c0_1, %c0_2] : memref<32x64xbf16, #tpu.memory_space<vmem>>, vector<32x64xbf16>
    %cst = arith.constant dense<0.000000e+00> : vector<16x64xf32>
    %3 = tpu.matmul %1, %2, %cst {dimension_numbers = #tpu.dot_dimension_numbers<[1], [0], [0], [1], [0, 0, 1, 1], [], []>} : vector<16x32xbf16>, vector<32x64xbf16>, vector<16x64xf32> -> vector<16x64xf32>
    %c0_3 = arith.constant 0 : index
    %c0_4 = arith.constant 0 : index
    %4 = vector.load %arg4[%c0_3, %c0_4] : memref<1x64xf32, #tpu.memory_space<vmem>>, vector<1x64xf32>
    %5 = vector.broadcast %4 : vector<1x64xf32> to vector<16x64xf32>
    %6 = arith.addf %3, %5 : vector<16x64xf32>
    %c0_5 = arith.constant 0 : index
    %c0_6 = arith.constant 0 : index
    %7 = vector.load %arg5[%c0_5, %c0_6] : memref<16x64xf32, #tpu.memory_space<vmem>>, vector<16x64xf32>
    tpu.vector_store %arg5[%c0_5, %c0_6], %6 {strides = array<i32>} : memref<16x64xf32, #tpu.memory_space<vmem>>, vector<16x64xf32>,
    return
  }
  func.func @transform_0(%arg0: i32, %arg1: i32) -> (i32, i32) {
    %c0_i32 = arith.constant 0 : i32
    %c0_i32_0 = arith.constant 0 : i32
    return %arg1, %c0_i32 : i32, i32
  }
  func.func @transform_1(%arg0: i32, %arg1: i32) -> (i32, i32) {
    %c0_i32 = arith.constant 0 : i32
    %c0_i32_0 = arith.constant 0 : i32
    return %c0_i32, %arg0 : i32, i32
  }
  func.func @transform_2(%arg0: i32, %arg1: i32) -> (i32, i32) {
    %c0_i32 = arith.constant 0 : i32
    %c0_i32_0 = arith.constant 0 : i32
    return %c0_i32, %arg0 : i32, i32
  }
  func.func @transform_3(%arg0: i32, %arg1: i32) -> (i32, i32) {
    %c0_i32 = arith.constant 0 : i32
    return %arg1, %arg0 : i32, i32
  }
}

</mosaic_0001>

<bundles_post_ra>
// kernel: tpu_custom_call.1
= control target key start
LH: loop header
LB: loop body
LE: loop exit
PB: predicated region body
PF: predicated region fallthrough
CT: control target
= control target key end

     0   :  { %8 = vsyncpa [#allocation3], 0  ;;  %s308_s0 = inlined_call_operand.hbm [shape: f32[16,32], index: 0, kind: input, shape index: {}]   ;;  %s309_s1 = inlined_call_operand.hbm [shape: bf16[32,64], index: 1, kind: input, shape index: {}]   ;;  %s310_s2 = inlined_call_operand.vmem [shape: f32[1,64], index: 2, kind: input, shape index: {}]   ;;  %s311_s3 = inlined_call_operand.hbm [shape: f32[16,64], index: 3, kind: output, shape index: {}]  }
   0x1   :  { %9 = vsyncpa [#allocation6], 0 }
   0x2   :  { %10 = vsyncpa [#allocation4], 0  ;;  %s234_s12 = smov [#allocation2]   ;;  %s162_s16 = scalar_lea.hbm %s308_s0, 256 }
   0x3   :  { %s16_s13 = sshll.u32 %s234_s12, 4  ;;  %p163_p0 = scmp.ne.s32.totalorder %s308_s0, %s162_s16  ;;  %s17_s13 = int_to_ptr.vmem [resolvable:$true] %s16_s13 }
   0x4   :  { %p166_p1 = scmp.lt.u32.totalorder %s162_s16, %s308_s0 }
   0x6   :  { %p168_p2 = pnand %p166_p1, %p163_p0 }
   0x8   :  { %171 = shalt.err (!%p168_p2)
}
   0x9   :  { %s172_s21 = scalar_lea.vmem %s17_s13, 256  ;;  %p177_p4 = scmp.lt.s32.totalorder %s17_s13, %s17_s13 }
   0xa   :  { %p173_p3 = scmp.ne.s32.totalorder %s17_s13, %s172_s21  ;;  %p178_p5 = scmp.lt.s32.totalorder %s172_s21, %s172_s21 }
   0xc   :  { %p179_p6 = por %p178_p5, %p177_p4 }
   0xe   :  { %p180_p7 = pnand %p179_p6, %p173_p3 }
  0x10   :  { %183 = shalt.err (!%p180_p7)
}
  0x11   :  { %s235_s22 = smov 128   ;;  %s236_s23 = smov 8  }
  0x12   :  { %22 = dma.hbm_to_vmem [thread:$0]  %s308_s0, 256, %s17_s13, [#allocation3], %s235_s22, %s235_s22, %s236_s23  }
  0x13   :  { %s237_s26 = smov [#allocation5]   ;;  %s184_s30 = scalar_lea.hbm %s309_s1, 256 }
  0x14   :  { %s28_s27 = sshll.u32 %s237_s26, 4  ;;  %p185_p8 = scmp.ne.s32.totalorder %s309_s1, %s184_s30  ;;  %s29_s27 = int_to_ptr.vmem [resolvable:$true] %s28_s27 }
  0x15   :  { %p188_p9 = scmp.lt.u32.totalorder %s184_s30, %s309_s1 }
  0x17   :  { %p190_p10 = pnand %p188_p9, %p185_p8 }
  0x19   :  { %193 = shalt.err (!%p190_p10)
}
  0x1a   :  { %s194_s8 = scalar_lea.vmem %s29_s27, 256  ;;  %p199_p12 = scmp.lt.s32.totalorder %s29_s27, %s29_s27 }
  0x1b   :  { %p195_p11 = scmp.ne.s32.totalorder %s29_s27, %s194_s8  ;;  %p200_p13 = scmp.lt.s32.totalorder %s194_s8, %s194_s8 }
  0x1d   :  { %p201_p0 = por %p200_p13, %p199_p12 }
  0x1f   :  { %p202_p1 = pnand %p201_p0, %p195_p11 }
  0x21   :  { %205 = shalt.err (!%p202_p1)
}
  0x22   :  { %s238_s0 = smov 64   ;;  %s239_s9 = smov 4  }
  0x23   :  { %34 = dma.hbm_to_vmem [thread:$0]  %s309_s1, 256, %s29_s27, [#allocation6], %s238_s0, %s238_s0, %s239_s9  }
  0x24   :  { %228 = dma.done.wait [#allocation3], 256  }
  0x25   :  { %229 = vsyncadd [#allocation3], 4294967040 }
  0x26   :  { %230 = dma.done.wait [#allocation6], 256  }
  0x27   :  { %231 = vsyncadd [#allocation6], 4294967040  ;;  %v240_v0 = vmov 0.0   ;;  %vm241_vm0 = vmmov 0   ;;  %v160_v1 = vld [vmem:[#allocation5] sm:$0xff]   ;;  %v161_v2 = vld [vmem:[#allocation5 + $0x8] sm:$0xff]  }
  0x28   :  { %143 = vmatprep.subr.bf16.mxu0 %v240_v0  ;;  %147 = vmatprep.mubr.msk.bf16.mxu0 %vm241_vm0, %v240_v0  ;;  %v44_v3 = vld [vmem:[#allocation2] sm:$0xff]  ;;  %v45_v4 = vld [vmem:[#allocation2 + $0x8] sm:$0xff]  ;;  %vm70_vm1 = vcmask 261120   ;;  %vm115_vm2 = vcmask 523264   ;;  %s242_s13 = smov [#allocation7]  }
  0x29   :  { %144 = vmatpush3.bf16.msra.mxu0 %v160_v1  ;;  %v46_v5 = vpack.c.bf16 %v45_v4, %v44_v3  ;;  %v136_v6 = vld [vmem:[%s310_s2] ss:$0 sm:$0xff]  ;;  %s123_s14 = sshll.u32 %s242_s13, 4  ;;  %s124_s14 = int_to_ptr.vmem [resolvable:$true] %s123_s14 }
  0x2a   :  { %145 = vmatprep.subr.bf16.mxu0 %v240_v0  ;;  %s206_s15 = scalar_lea.vmem %s124_s14, 256  ;;  %p211_p3 = scmp.lt.s32.totalorder %s124_s14, %s124_s14 }
  0x2b   :  { %p207_p2 = scmp.ne.s32.totalorder %s124_s14, %s206_s15  ;;  %p212_p4 = scmp.lt.s32.totalorder %s206_s15, %s206_s15 }
  0x2d   :  { %146 = vmatpush3.bf16.msra.mxu0 %v161_v2  ;;  %p213_p5 = por %p212_p4, %p211_p3 }
  0x2f   :  { %p214_p6 = pnand %p213_p5, %p207_p2 }
  0x30   :  { %148 = vmatmul.mubr.msk.bf16.vlgmr.msra.gmra.mrb[0].mxu0 %vm70_vm1, %v46_v5 }
 0x103   :  { %v108_v7 = vpop.f32.mrb[0].mxu0 }
 0x104   :  { %v109_v8 = vadd.f32 %v136_v6, %v108_v7  ;;  %v149_v9 = vpop.f32.mrb[1].mxu0 }
 0x105   :  { %v111_v10 = vpop.f32.mrb[2].mxu0 }
 0x106   :  { %v112_v11 = vadd.f32 %v136_v6, %v111_v10  ;;  %v150_v12 = vpop.f32.mrb[3].mxu0  ;;  %116 = vst.msk [vmem:[#allocation7] sm:$0xff] %vm115_vm2, %v109_v8 }
 0x108   :  { %117 = vst.msk [vmem:[#allocation7 + $0x8] sm:$0xff] %vm115_vm2, %v112_v11 }
 0x109   :  { %217 = shalt.err (!%p214_p6)
}
 0x10a   :  { %s218_s17 = scalar_lea.hbm %s311_s3, 256 }
 0x10b   :  { %p219_p7 = scmp.ne.s32.totalorder %s311_s3, %s218_s17  ;;  %p222_p8 = scmp.lt.u32.totalorder %s218_s17, %s311_s3 }
 0x10d   :  { %p224_p9 = pnand %p222_p8, %p219_p7 }
 0x10f   :  { %227 = shalt.err (!%p224_p9)
}
 0x110   :  { %129 = dma.vmem_to_hbm [thread:$0]  %s124_s14, 256, %s311_s3, [#allocation4], %s235_s22, %s235_s22, %s236_s23  }
 0x111   :  { %232 = dma.done.wait [#allocation4], 256  }
 0x112   :  { %233 = vsyncadd [#allocation4], 4294967040 }
 0x113   :  { %133 = vsyncpa [#allocation3], 1 }
 0x114   :  { %134 = vsyncpa [#allocation6], 1 }
 0x115   :  { %135 = vsyncpa [#allocation4], 1 }

</bundles_post_ra>
